<compile_context>
chip_gen: v5e
topology: v5e:2x2
jax: 0.10.0
libtpu: 0.0.40
codegen_flags: <defaults>
</compile_context>

<pallas_src>
import math

import jax
import jax.numpy as jnp
import numpy as np
from jax.experimental import pallas as pl
from jax.experimental.pallas import tpu as pltpu


def _log_binomial(n: int, k: int) -> float:
    return math.lgamma(n + 1) - math.lgamma(k + 1) - math.lgamma(n - k + 1)


def _log_sigmoid(w):
    # Numerically stable logsigmoid: min(w, 0) - log1p(exp(-|w|))
    return jnp.minimum(w, 0.0) - jnp.log1p(jnp.exp(-jnp.abs(w)))


def _vmem_capacity_bytes() -> int:
    try:
        return int(pltpu.get_tpu_info().vmem_capacity_bytes)
    except Exception:  # pragma: no cover - conservative fallback
        return 128 * 1024 * 1024


def _plan_tiles(B, D, RK, block_b=None):
    """Pick (num_d_blocks, Dt, batch_tile, vmem_limit) for the flat (B, D*RK) output."""
    vmem_cap = _vmem_capacity_bytes()
    # Generation-aware footprint cap: <= 40 MiB, and <= 5/8 of physical VMEM
    # (v7x: 64 MiB physical -> 40 MiB; v5e/v6e: 128 MiB -> 40 MiB).
    budget = min(40 * (1 << 20), (vmem_cap * 5) // 8)

    def tile_bytes(bt, dt):
        n = dt * RK
        out_b = bt * n * 4            # output tile
        in_b = bt * 2 * dt * 4        # packed [x | lbc] tile
        m_b = 2 * dt * n * 4          # resident expansion matrix block
        c_b = n * 4                   # resident constant block
        return 2 * (out_b + in_b + m_b + c_b)   # double-buffered

    nd, Dt = 1, D
    min_bt = min(8, B)
    if tile_bytes(min_bt, D) > budget:
        # D*RK is huge: tile the D axis too (weight/M no longer fully resident).
        for cand in range(2, D + 1):
            if D % cand:
                continue
            dt = D // cand
            # non-final blocks must keep the last dim a multiple of 128 lanes
            if (2 * dt) % 128 or (dt * RK) % 128:
                continue
            if tile_bytes(min_bt, dt) <= budget:
                nd, Dt = cand, dt
                break
        # TODO(synk): if no 128-lane-aligned divisor of D fits the budget, pad
        # D in the wrapper instead of falling back to one oversized block.

    n = Dt * RK
    if block_b is not None:
        bt = int(block_b)
    else:
        # ~8 MiB output tiles (review: 2 MiB tiles leave grid-step overhead visible)
        bt = max(8, ((8 * (1 << 20)) // (n * 4)) // 8 * 8)
        while bt > 8 and tile_bytes(bt, Dt) > budget:
            bt = max(8, (bt // 2) // 8 * 8)
        bt = min(bt, B)
        # v7x has 2 TensorCores: keep >= 2 "parallel" grid steps when possible.
        if nd == 1 and bt >= B and B >= 16:
            half = -(-B // 2)
            bt = -(-half // 8) * 8
    bt = min(bt, B)

    vmem_limit = int(min(max(16 * (1 << 20), tile_bytes(bt, Dt) + (4 << 20)),
                         (vmem_cap * 3) // 4))
    return nd, Dt, bt, vmem_limit


def make_monotonic_binomial_forward(num_variables, num_replicas, num_components,
                                    num_states, block_b=None):
    """Returns (forward, total_count, log_bcoeffs);
    forward(x_int32[B, D], weight[D, R, K]) -> log_y[B, D, R, K] float32."""
    D, R, K = num_variables, num_replicas, num_components
    RK = R * K
    total_count = num_states - 1
    log_bcoeffs = np.asarray(
        [_log_binomial(total_count, k) for k in range(num_states)],
        dtype=np.float32)
    lbc_table = jnp.asarray(log_bcoeffs)
    tc_f32 = np.float32(total_count)

    def kernel(xl_ref, m_ref, c_ref, o_ref):
        # xl_ref: (bt, 2*Dt)     packed [x | log_bcoeffs[x]] for this D-block
        # m_ref : (2*Dt, Dt*RK)  [[E * w], [E]]  (one-hot lane expansion, w folded)
        # c_ref : (1, Dt*RK)     total_count * (logsigmoid(w) - w)
        # o_ref : (bt, Dt*RK)    lane-dense output block
        # out[b, d*RK+j] = x[b,d]*w[d,j] + lbc[b,d] + c[d,j]  -> one MXU matmul + add.
        o_ref[...] = (jnp.dot(xl_ref[...], m_ref[...],
                              preferred_element_type=jnp.float32)
                      + c_ref[...])

    def _forward(x, weight):
        B = x.shape[0]
        assert x.shape == (B, D)
        assert weight.shape == (D, R, K)

        nd, Dt, bt, vmem_limit = _plan_tiles(B, D, RK, block_b)
        n = Dt * RK

        # ---- wrapper precompute (all RK-times smaller than the output) ----
        # NOTE: JAX clamps out-of-range gather indices; PyTorch would error on
        # x outside [0, num_states).
        x_f = x.astype(jnp.float32)                  # (B, D)
        lbc = lbc_table[x]                           # (B, D) tiny gather
        if nd == 1:
            xl = jnp.concatenate([x_f, lbc], axis=1)                       # (B, 2D)
        else:  # interleave per D-block so each grid step reads one contiguous slice
            xl = jnp.concatenate([x_f.reshape(B, nd, Dt),
                                  lbc.reshape(B, nd, Dt)],
                                 axis=2).reshape(B, nd * 2 * Dt)

        # Weight-only constants (would be cached per weight update in a real layer).
        w_flat = weight.reshape(D, RK).astype(jnp.float32)                 # (D, RK)
        log_p = _log_sigmoid(w_flat)
        c = (tc_f32 * (log_p - w_flat)).reshape(nd, 1, n)                  # exact log(1-sigmoid)
        # One-hot lane-expansion matrix: E[a, a*RK + j] = 1.
        E = jnp.kron(jnp.eye(Dt, dtype=jnp.float32),
                     jnp.ones((1, RK), jnp.float32))                       # (Dt, Dt*RK)
        w_b = w_flat.reshape(nd, n)
        M = jnp.concatenate([E[None] * w_b[:, None, :],                    # x rows: E*w
                             jnp.broadcast_to(E[None], (nd, Dt, n))],      # lbc rows: E
                            axis=1)                                        # (nd, 2*Dt, n)

        grid = (nd, pl.cdiv(B, bt))
        out = pl.pallas_call(
            kernel,
            out_shape=jax.ShapeDtypeStruct((B, nd * n), jnp.float32),
            grid=grid,
            in_specs=[
                pl.BlockSpec((bt, 2 * Dt), lambda t, i: (i, t)),
                pl.BlockSpec((None, 2 * Dt, n), lambda t, i: (t, 0, 0)),
                pl.BlockSpec((None, 1, n), lambda t, i: (t, 0, 0)),
            ],
            out_specs=pl.BlockSpec((bt, n), lambda t, i: (i, t)),
            compiler_params=pltpu.CompilerParams(
                dimension_semantics=("parallel", "parallel"),
                vmem_limit_bytes=vmem_limit),
        )(xl, M, c)

        return out.reshape(B, D, R, K)   # trivial dim split, no data movement

    return jax.jit(_forward), total_count, log_bcoeffs


def _reference(x, weight, total_count, log_bcoeffs):
    # Pure-JAX mirror of the PyTorch forward (same formula as the module).
    log_p = _log_sigmoid(weight)[None]                       # (1, D, R, K)
    x4 = x.astype(jnp.float32)[:, :, None, None]             # (B, D, 1, 1)
    lbc = jnp.asarray(log_bcoeffs)[x][:, :, None, None]      # (B, D, 1, 1)
    return lbc + x4 * log_p + (total_count - x4) * jnp.log1p(-jnp.exp(log_p))


def _run_case(key, B, D, R, K, num_states, block_b=None):
    kx, kw = jax.random.split(key)
    # deterministic "init_params_(weight, 'uniform', 0.0, 1.0)" then torch.logit
    w_uniform = jax.random.uniform(kw, (D, R, K), jnp.float32,
                                   minval=0.05, maxval=0.95)
    weight = jnp.log(w_uniform) - jnp.log1p(-w_uniform)
    x = jax.random.randint(kx, (B, D), 0, num_states, dtype=jnp.int32)

    forward, total_count, log_bcoeffs = make_monotonic_binomial_forward(
        D, R, K, num_states, block_b=block_b)
    log_y = forward(x, weight)
    jax.block_until_ready(log_y)

    ref = _reference(x, weight, total_count, log_bcoeffs)
    assert log_y.shape == (B, D, R, K)
    np.testing.assert_allclose(np.asarray(log_y), np.asarray(ref),
                               rtol=1e-5, atol=1e-5)
    return log_y


if __name__ == "__main__":
    key = jax.random.PRNGKey(0)
    k1, k2, k3 = jax.random.split(key, 3)
    # Toy shapes implied by the module (single-block path).
    _run_case(k1, B=2, D=16, R=1, K=4, num_states=3)
    # Forced small batch tile: exercises the multi-step batch grid.
    _run_case(k2, B=32, D=16, R=2, K=8, num_states=5, block_b=8)
    # Auto planner: exercises the ">= 2 parallel steps" split for v7x megacore.
    _run_case(k3, B=64, D=16, R=2, K=8, num_states=4)
    print("KERNEL_OK")
</pallas_src>

<mosaic_0001>
module attributes {stable_mosaic.version = 11 : i64} {
  func.func @kernel(%arg0: i32, %arg1: i32, %arg2: memref<2x32xf32, #tpu.memory_space<vmem>>, %arg3: memref<1x32x64xf32, #tpu.memory_space<vmem>>, %arg4: memref<1x1x64xf32, #tpu.memory_space<vmem>>, %arg5: memref<2x64xf32, #tpu.memory_space<vmem>>) attributes {dimension_semantics = [#tpu.dimension_semantics<parallel>, #tpu.dimension_semantics<parallel>], iteration_bounds = array<i64: 1, 1>, scalar_prefetch = 0 : i64, scratch_operands = 0 : i64, tpu.core_type = #tpu.core_type<tc>, window_params = [{transform_indices = @transform_0, window_bounds = array<i64: 2, 32>}, {transform_indices = @transform_1, window_bounds = array<i64: 1, 32, 64>}, {transform_indices = @transform_2, window_bounds = array<i64: 1, 1, 64>}, {transform_indices = @transform_3, window_bounds = array<i64: 2, 64>}]} {
    %c0 = arith.constant 0 : index
    %c0_0 = arith.constant 0 : index
    %0 = vector.load %arg2[%c0, %c0_0] : memref<2x32xf32, #tpu.memory_space<vmem>>, vector<2x32xf32>
    %c0_1 = arith.constant 0 : index
    %c0_2 = arith.constant 0 : index
    %c0_3 = arith.constant 0 : index
    %1 = vector.load %arg3[%c0_1, %c0_2, %c0_3] : memref<1x32x64xf32, #tpu.memory_space<vmem>>, vector<1x32x64xf32>
    %2 = vector.shape_cast %1 : vector<1x32x64xf32> to vector<32x64xf32>
    %cst = arith.constant dense<0.000000e+00> : vector<2x64xf32>
    %3 = tpu.matmul %0, %2, %cst {dimension_numbers = #tpu.dot_dimension_numbers<[1], [0], [0], [1], [0, 0, 1, 1], [], []>} : vector<2x32xf32>, vector<32x64xf32>, vector<2x64xf32> -> vector<2x64xf32>
    %c0_4 = arith.constant 0 : index
    %c0_5 = arith.constant 0 : index
    %c0_6 = arith.constant 0 : index
    %4 = vector.load %arg4[%c0_4, %c0_5, %c0_6] : memref<1x1x64xf32, #tpu.memory_space<vmem>>, vector<1x1x64xf32>
    %5 = vector.shape_cast %4 : vector<1x1x64xf32> to vector<1x64xf32>
    %6 = vector.broadcast %5 : vector<1x64xf32> to vector<2x64xf32>
    %7 = arith.addf %3, %6 : vector<2x64xf32>
    %c0_7 = arith.constant 0 : index
    %c0_8 = arith.constant 0 : index
    %8 = vector.load %arg5[%c0_7, %c0_8] : memref<2x64xf32, #tpu.memory_space<vmem>>, vector<2x64xf32>
    tpu.vector_store %arg5[%c0_7, %c0_8], %7 {strides = array<i32>} : memref<2x64xf32, #tpu.memory_space<vmem>>, vector<2x64xf32>,
    return
  }
  func.func @transform_0(%arg0: i32, %arg1: i32) -> (i32, i32) {
    %c0_i32 = arith.constant 0 : i32
    return %arg1, %arg0 : i32, i32
  }
  func.func @transform_1(%arg0: i32, %arg1: i32) -> (i32, i32, i32) {
    %c0_i32 = arith.constant 0 : i32
    %c0_i32_0 = arith.constant 0 : i32
    %c0_i32_1 = arith.constant 0 : i32
    return %arg0, %c0_i32, %c0_i32_0 : i32, i32, i32
  }
  func.func @transform_2(%arg0: i32, %arg1: i32) -> (i32, i32, i32) {
    %c0_i32 = arith.constant 0 : i32
    %c0_i32_0 = arith.constant 0 : i32
    %c0_i32_1 = arith.constant 0 : i32
    return %arg0, %c0_i32, %c0_i32_0 : i32, i32, i32
  }
  func.func @transform_3(%arg0: i32, %arg1: i32) -> (i32, i32) {
    %c0_i32 = arith.constant 0 : i32
    return %arg1, %arg0 : i32, i32
  }
}

</mosaic_0001>

<bundles_post_ra>
// kernel: _forward.1
= control target key start
LH: loop header
LB: loop body
LE: loop exit
PB: predicated region body
PF: predicated region fallthrough
CT: control target
= control target key end

     0   :  { %vm23_vm0 = vcmask 261120   ;;  %vm47_vm1 = vcmask 517120   ;;  %s96_s1 = inlined_call_operand.vmem [shape: f32[1,32,64], index: 1, kind: input, shape index: {}]   ;;  %s97_s2 = inlined_call_operand.vmem [shape: f32[1,1,64], index: 2, kind: input, shape index: {}]   ;;  %s98_s0 = inlined_call_operand.vmem [shape: f32[2,32], index: 0, kind: input, shape index: {}]   ;;  %s99_s3 = inlined_call_operand.vmem [shape: f32[2,64], index: 3, kind: output, shape index: {}]  }
   0x1   :  { %v18_v0 = vld [vmem:[%s96_s1 + $0x18] sm:$0xff]  ;;  %v17_v1 = vld [vmem:[%s96_s1 + $0x10] sm:$0xff]  ;;  %v16_v2 = vld [vmem:[%s96_s1 + $0x8] sm:$0xff] }
   0x2   :  { %39 = vmatpush.msra.mxu0 %v18_v0  ;;  %v15_v3 = vld [vmem:[%s96_s1] sm:$0xff] }
   0x3   :  { %v14_v4 = vld [vmem:[%s98_s0] sm:$0x3] }
   0x4   :  { %40 = vmatpush.msra.mxu0 %v17_v1  ;;  %v54_v5 = vld [vmem:[%s97_s2] ss:$0 sm:$0xff] }
   0x6   :  { %41 = vmatpush.msra.mxu0 %v16_v2 }
   0x8   :  { %42 = vmatpush.msra.mxu0 %v15_v3 }
   0x9   :  { %53 = vmatmul.msk.f32.vlgmr.msra.gmra.mxu0 %vm23_vm0, %v14_v4 }
  0x86   :  { %v44_v6 = vpop.f32.mrf.mxu0 }
  0x87   :  { %v45_v7 = vadd.f32 %v54_v5, %v44_v6 }
  0x89   :  { %48 = vst.msk [vmem:[%s99_s3] sm:$0x3] %vm47_vm1, %v45_v7 }

</bundles_post_ra>
